<compile_context>
chip_gen: v5e
topology: v5e:2x2
jax: 0.10.0
libtpu: 0.0.40
codegen_flags: <defaults>
</compile_context>

<pallas_src>
import functools
import math

import jax
import jax.numpy as jnp
from jax.experimental import pallas as pl
from jax.experimental.pallas import tpu as pltpu


# ----------------------------- small helpers ---------------------------------

def _round_up(a, b):
    return (a + b - 1) // b * b


def _pad_rows(a, rows):
    if a.shape[0] == rows:
        return a
    return jnp.pad(a, ((0, rows - a.shape[0]), (0, 0)))


def _pick_hidden_tile(hidden, cap=2048):
    """Largest multiple-of-128 divisor of `hidden` not exceeding `cap`.
    (On v7x with 64 MiB VMEM prefer a smaller cap, e.g. 512-1024.)"""
    best = 128
    t = 128
    while t <= min(hidden, cap):
        if hidden % t == 0:
            best = t
        t += 128
    return best


# Rotary embedding (interleaved, identical math to torch.view_as_complex path).
# TODO(synk): RoPE pair rotation is applied in plain JAX in the wrapper; fusing the
# interleaved even/odd lane shuffle into the QKV kernel is awkward in Mosaic.
def precompute_rope(head_dim, seq_len, theta=10000.0):
    inv_freq = 1.0 / (theta ** (jnp.arange(0, head_dim, 2, dtype=jnp.float32) / head_dim))
    t = jnp.arange(seq_len, dtype=jnp.float32)
    ang = jnp.outer(t, inv_freq)                      # (seq, head_dim//2)
    return jnp.cos(ang), jnp.sin(ang)


def apply_rope(x, cos, sin):
    # x: (bsz, seq, n_heads, head_dim)
    xr = x.astype(jnp.float32).reshape(*x.shape[:-1], -1, 2)
    x0, x1 = xr[..., 0], xr[..., 1]
    c = cos[None, :, None, :]
    s = sin[None, :, None, :]
    o0 = x0 * c - x1 * s
    o1 = x0 * s + x1 * c
    return jnp.stack([o0, o1], axis=-1).reshape(x.shape).astype(x.dtype)


# ------------------------------ Pallas kernels --------------------------------

def _rmsnorm_matmul_kernel(x_ref, g_ref, w_ref, o_ref, *, eps):
    """o = rmsnorm(x) * g  @  W      (norm in f32, matmul in bf16 on the MXU)."""
    x = x_ref[...].astype(jnp.float32)                     # (tm, dim)
    ms = jnp.mean(x * x, axis=-1, keepdims=True)
    xn = x * jax.lax.rsqrt(ms + eps) * g_ref[...]          # f32
    y = jnp.dot(xn.astype(w_ref.dtype), w_ref[...],
                preferred_element_type=jnp.float32)
    o_ref[...] = y.astype(o_ref.dtype)


def _attention_kernel(q_ref, k_ref, v_ref, mask_ref, o_ref, *, scale):
    """One (batch, head) slice: softmax(q k^T * scale + mask) v   (f32)."""
    q = q_ref[0]                                           # (seq, hd)
    kk = k_ref[0]
    vv = v_ref[0]
    s = jax.lax.dot_general(q, kk, (((1,), (1,)), ((), ())),
                            preferred_element_type=jnp.float32) * scale
    s = s + mask_ref[...]
    m = jnp.max(s, axis=-1, keepdims=True)
    p = jnp.exp(s - m)
    p = p / jnp.sum(p, axis=-1, keepdims=True)
    o_ref[0] = jnp.dot(p, vv, preferred_element_type=jnp.float32).astype(o_ref.dtype)


def _residual_matmul_kernel(a_ref, res_ref, w_ref, o_ref):
    """o = res + a @ W    (a cast to bf16 for the MXU, accumulate/add in f32)."""
    a = a_ref[...].astype(w_ref.dtype)
    y = jnp.dot(a, w_ref[...], preferred_element_type=jnp.float32)
    o_ref[...] = (res_ref[...].astype(jnp.float32) + y).astype(o_ref.dtype)


def _ffn_kernel(h_ref, g_ref, w13_ref, w2_ref, o_ref, xn_ref, acc_ref, *, eps, th):
    """Fused ffn_norm + SwiGLU FFN + residual, hidden dimension tiled on grid axis 1.

    h_ref  : (tm, dim)       residual / norm input (f32), resident across k
    g_ref  : (1, dim)        rmsnorm weight (f32)
    w13_ref: (dim, 2*th)     [w1_k | w3_k] bf16 tile of fused gate/value weight
    w2_ref : (th, dim)       bf16 tile of w2^T
    o_ref  : (tm, dim)       output (written on last k only)
    xn_ref : (tm, dim) bf16  scratch: normalized input, computed once per row tile
    acc_ref: (tm, dim) f32   scratch accumulator over hidden tiles
    """
    k = pl.program_id(1)

    @pl.when(k == 0)
    def _init():
        h = h_ref[...].astype(jnp.float32)
        ms = jnp.mean(h * h, axis=-1, keepdims=True)
        xn = h * jax.lax.rsqrt(ms + eps) * g_ref[...]
        xn_ref[...] = xn.astype(xn_ref.dtype)              # bf16 for the MXU
        acc_ref[...] = jnp.zeros_like(acc_ref)

    xn = xn_ref[...]                                        # (tm, dim) bf16
    p = jnp.dot(xn, w13_ref[...], preferred_element_type=jnp.float32)  # (tm, 2*th)
    h1 = p[:, :th]
    h3 = p[:, th:]
    gate = h1 * jax.nn.sigmoid(h1)                          # silu in f32
    hk = (gate * h3).astype(w2_ref.dtype)                   # bf16 into second matmul
    acc_ref[...] += jnp.dot(hk, w2_ref[...], preferred_element_type=jnp.float32)

    @pl.when(k == pl.num_programs(1) - 1)
    def _finalize():
        o_ref[...] = (h_ref[...].astype(jnp.float32) + acc_ref[...]).astype(o_ref.dtype)


# ------------------------- parameter prep (done ONCE) -------------------------

def prepare_transformer_block_params(wq, wk, wv, wo, w1, w2, w3,
                                      attn_norm_w, ffn_norm_w,
                                      *, n_heads, eps, th=None):
    """Pre-transpose / fuse / cast weights once (not per call). PyTorch Linear
    weights are (out_features, in_features)."""
    dim = wq.shape[1]
    hidden = w1.shape[0]
    assert dim % 128 == 0 and hidden % 128 == 0
    if th is None:
        th = _pick_hidden_tile(hidden)
    assert hidden % th == 0 and th % 128 == 0
    kt = hidden // th

    wqkv_t = jnp.concatenate([wq.T, wk.T, wv.T], axis=1).astype(jnp.bfloat16)  # (dim, 3*dim)
    wo_t = wo.T.astype(jnp.bfloat16)                                            # (dim, dim)
    # Interleave w1/w3 per hidden-tile so block k of width 2*th is [w1_k | w3_k].
    w13_t = jnp.concatenate(
        [w1.T.reshape(dim, kt, th), w3.T.reshape(dim, kt, th)], axis=-1
    ).reshape(dim, 2 * hidden).astype(jnp.bfloat16)                             # (dim, 2*hidden)
    w2_t = w2.T.astype(jnp.bfloat16)                                            # (hidden, dim)

    return dict(
        wqkv_t=wqkv_t, wo_t=wo_t, w13_t=w13_t, w2_t=w2_t,
        attn_norm_w=attn_norm_w.reshape(1, dim).astype(jnp.float32),
        ffn_norm_w=ffn_norm_w.reshape(1, dim).astype(jnp.float32),
        n_heads=int(n_heads), eps=float(eps), th=int(th), hidden=int(hidden),
    )


# ------------------------------- forward pass ---------------------------------

def transformer_block_forward(params, x, rope_cos, rope_sin, mask, *, tm=128):
    n_heads = params["n_heads"]
    eps = params["eps"]
    th = params["th"]
    hidden = params["hidden"]

    bsz, seq, dim = x.shape
    hd = dim // n_heads
    M = bsz * seq

    tm_eff = min(tm, _round_up(M, 8))
    Mp = _round_up(M, tm_eff)
    n_row_tiles = Mp // tm_eff
    cparams_rows = pltpu.CompilerParams(
        dimension_semantics=("parallel",), vmem_limit_bytes=64 * 1024 * 1024)

    x2d = _pad_rows(x.reshape(M, dim).astype(jnp.float32), Mp)

    # --- K1: attention_norm + fused QKV projection ----------------------------
    qkv = pl.pallas_call(
        functools.partial(_rmsnorm_matmul_kernel, eps=eps),
        out_shape=jax.ShapeDtypeStruct((Mp, 3 * dim), jnp.float32),
        grid_spec=pltpu.PrefetchScalarGridSpec(
            num_scalar_prefetch=0,
            grid=(n_row_tiles,),
            in_specs=[
                pl.BlockSpec((tm_eff, dim), lambda i: (i, 0)),
                pl.BlockSpec((1, dim), lambda i: (0, 0)),
                pl.BlockSpec((dim, 3 * dim), lambda i: (0, 0)),
            ],
            out_specs=pl.BlockSpec((tm_eff, 3 * dim), lambda i: (i, 0)),
        ),
        compiler_params=cparams_rows,
    )(x2d, params["attn_norm_w"], params["wqkv_t"])

    qkv = qkv[:M]
    xq = qkv[:, 0 * dim:1 * dim].reshape(bsz, seq, n_heads, hd)
    xk = qkv[:, 1 * dim:2 * dim].reshape(bsz, seq, n_heads, hd)
    xv = qkv[:, 2 * dim:3 * dim].reshape(bsz, seq, n_heads, hd)

    xq = apply_rope(xq, rope_cos, rope_sin)
    xk = apply_rope(xk, rope_cos, rope_sin)

    BH = bsz * n_heads
    q = xq.transpose(0, 2, 1, 3).reshape(BH, seq, hd)
    k = xk.transpose(0, 2, 1, 3).reshape(BH, seq, hd)
    v = xv.transpose(0, 2, 1, 3).reshape(BH, seq, hd)

    # --- K2: attention core per (batch, head) ---------------------------------
    attn = pl.pallas_call(
        functools.partial(_attention_kernel, scale=1.0 / math.sqrt(hd)),
        out_shape=jax.ShapeDtypeStruct((BH, seq, hd), jnp.float32),
        grid_spec=pltpu.PrefetchScalarGridSpec(
            num_scalar_prefetch=0,
            grid=(BH,),
            in_specs=[
                pl.BlockSpec((1, seq, hd), lambda b: (b, 0, 0)),
                pl.BlockSpec((1, seq, hd), lambda b: (b, 0, 0)),
                pl.BlockSpec((1, seq, hd), lambda b: (b, 0, 0)),
                pl.BlockSpec((seq, seq), lambda b: (0, 0)),
            ],
            out_specs=pl.BlockSpec((1, seq, hd), lambda b: (b, 0, 0)),
        ),
        compiler_params=pltpu.CompilerParams(
            dimension_semantics=("parallel",), vmem_limit_bytes=64 * 1024 * 1024),
    )(q, k, v, mask.astype(jnp.float32))

    attn2d = attn.reshape(bsz, n_heads, seq, hd).transpose(0, 2, 1, 3).reshape(M, dim)
    attn2d = _pad_rows(attn2d, Mp)

    # --- K3: output projection + residual --------------------------------------
    h2d = pl.pallas_call(
        _residual_matmul_kernel,
        out_shape=jax.ShapeDtypeStruct((Mp, dim), jnp.float32),
        grid_spec=pltpu.PrefetchScalarGridSpec(
            num_scalar_prefetch=0,
            grid=(n_row_tiles,),
            in_specs=[
                pl.BlockSpec((tm_eff, dim), lambda i: (i, 0)),
                pl.BlockSpec((tm_eff, dim), lambda i: (i, 0)),
                pl.BlockSpec((dim, dim), lambda i: (0, 0)),
            ],
            out_specs=pl.BlockSpec((tm_eff, dim), lambda i: (i, 0)),
        ),
        compiler_params=cparams_rows,
    )(attn2d, x2d, params["wo_t"])

    # --- K4: ffn_norm + SwiGLU FFN + residual (hidden-tiled reduction) ---------
    n_hidden_tiles = hidden // th
    out2d = pl.pallas_call(
        functools.partial(_ffn_kernel, eps=eps, th=th),
        out_shape=jax.ShapeDtypeStruct((Mp, dim), jnp.float32),
        grid_spec=pltpu.PrefetchScalarGridSpec(
            num_scalar_prefetch=0,
            grid=(n_row_tiles, n_hidden_tiles),
            in_specs=[
                pl.BlockSpec((tm_eff, dim), lambda i, kk: (i, 0)),
                pl.BlockSpec((1, dim), lambda i, kk: (0, 0)),
                pl.BlockSpec((dim, 2 * th), lambda i, kk: (0, kk)),
                pl.BlockSpec((th, dim), lambda i, kk: (kk, 0)),
            ],
            out_specs=pl.BlockSpec((tm_eff, dim), lambda i, kk: (i, 0)),
            scratch_shapes=[
                pltpu.VMEM((tm_eff, dim), jnp.bfloat16),   # normalized input cache
                pltpu.VMEM((tm_eff, dim), jnp.float32),    # f32 accumulator
            ],
        ),
        compiler_params=pltpu.CompilerParams(
            dimension_semantics=("parallel", "arbitrary"),
            vmem_limit_bytes=64 * 1024 * 1024),
    )(h2d, params["ffn_norm_w"], params["w13_t"], params["w2_t"])

    return out2d[:M].reshape(bsz, seq, dim)


# ------------------------------ pure-JAX reference -----------------------------

def reference_block(x, wq, wk, wv, wo, w1, w2, w3, attn_norm_w, ffn_norm_w,
                    rope_cos, rope_sin, mask, n_heads, eps):
    def rmsnorm(z, w):
        zf = z.astype(jnp.float32)
        return zf * jax.lax.rsqrt(jnp.mean(zf * zf, axis=-1, keepdims=True) + eps) * w

    bsz, seq, dim = x.shape
    hd = dim // n_heads

    xn = rmsnorm(x, attn_norm_w)
    xq = (xn @ wq.T).reshape(bsz, seq, n_heads, hd)
    xk = (xn @ wk.T).reshape(bsz, seq, n_heads, hd)
    xv = (xn @ wv.T).reshape(bsz, seq, n_heads, hd)
    xq = apply_rope(xq, rope_cos, rope_sin)
    xk = apply_rope(xk, rope_cos, rope_sin)

    q = xq.transpose(0, 2, 1, 3)
    k = xk.transpose(0, 2, 1, 3)
    v = xv.transpose(0, 2, 1, 3)
    scores = jnp.einsum("bhqd,bhkd->bhqk", q, k) / math.sqrt(hd) + mask
    probs = jax.nn.softmax(scores.astype(jnp.float32), axis=-1)
    attn = jnp.einsum("bhqk,bhkd->bhqd", probs, v)
    attn = attn.transpose(0, 2, 1, 3).reshape(bsz, seq, dim)
    h = x + attn @ wo.T

    hn = rmsnorm(h, ffn_norm_w)
    ffn = (jax.nn.silu(hn @ w1.T) * (hn @ w3.T)) @ w2.T
    return h + ffn


# ------------------------------------ main -------------------------------------

if __name__ == "__main__":
    # TransformerBlock hyperparameters (small but structurally faithful).
    dim = 128
    n_heads = 4
    head_dim = dim // n_heads
    multiple_of = 256          # ModelArgs default
    norm_eps = 1e-5
    batch, seq = 2, 128        # M = 256 -> two row tiles of tm=128

    # FeedForward hidden size exactly as the module computes it (hidden_dim = 4*dim).
    hidden_dim = int(2 * (4 * dim) / 3)
    hidden_dim = multiple_of * ((hidden_dim + multiple_of - 1) // multiple_of)  # 512

    key = jax.random.PRNGKey(0)
    ks = jax.random.split(key, 12)
    x = jax.random.normal(ks[0], (batch, seq, dim), dtype=jnp.float32)
    # PyTorch nn.Linear weight layout: (out_features, in_features)
    wq = 0.02 * jax.random.normal(ks[1], (dim, dim), dtype=jnp.float32)
    wk = 0.02 * jax.random.normal(ks[2], (dim, dim), dtype=jnp.float32)
    wv = 0.02 * jax.random.normal(ks[3], (dim, dim), dtype=jnp.float32)
    wo = 0.02 * jax.random.normal(ks[4], (dim, dim), dtype=jnp.float32)
    w1 = 0.02 * jax.random.normal(ks[5], (hidden_dim, dim), dtype=jnp.float32)
    w2 = 0.02 * jax.random.normal(ks[6], (dim, hidden_dim), dtype=jnp.float32)
    w3 = 0.02 * jax.random.normal(ks[7], (hidden_dim, dim), dtype=jnp.float32)
    attn_norm_w = 1.0 + 0.05 * jax.random.normal(ks[8], (dim,), dtype=jnp.float32)
    ffn_norm_w = 1.0 + 0.05 * jax.random.normal(ks[9], (dim,), dtype=jnp.float32)

    # Rotary tables (start_pos = 0) and causal additive mask.
    rope_cos, rope_sin = precompute_rope(head_dim, seq)
    rows = jnp.arange(seq)
    mask = jnp.where(rows[None, :] > rows[:, None], -1e30, 0.0).astype(jnp.float32)

    # One-time weight prep (pre-transpose / fuse / bf16 cast) — not per call.
    params = prepare_transformer_block_params(
        wq, wk, wv, wo, w1, w2, w3, attn_norm_w, ffn_norm_w,
        n_heads=n_heads, eps=norm_eps, th=256)   # th=256 -> two hidden tiles

    out = transformer_block_forward(params, x, rope_cos, rope_sin, mask, tm=128)
    out = jax.block_until_ready(out)

    ref = reference_block(x, wq, wk, wv, wo, w1, w2, w3, attn_norm_w, ffn_norm_w,
                          rope_cos, rope_sin, mask, n_heads, norm_eps)

    assert out.shape == (batch, seq, dim)
    # bf16 MXU path vs f32 reference -> loosened tolerance.
    assert jnp.allclose(out, ref, atol=2e-2, rtol=2e-2), (
        f"mismatch vs reference, max abs err = {float(jnp.max(jnp.abs(out - ref)))}")

    print("KERNEL_OK")
</pallas_src>

<mosaic_0001>
module attributes {stable_mosaic.version = 11 : i64} {
  func.func @_rmsnorm_matmul_kernel(%arg0: i32, %arg1: memref<128x128xf32, #tpu.memory_space<vmem>>, %arg2: memref<1x128xf32, #tpu.memory_space<vmem>>, %arg3: memref<128x384xbf16, #tpu.memory_space<vmem>>, %arg4: memref<128x384xf32, #tpu.memory_space<vmem>>) attributes {dimension_semantics = [#tpu.dimension_semantics<parallel>], iteration_bounds = array<i64: 2>, scalar_prefetch = 0 : i64, scratch_operands = 0 : i64, tpu.core_type = #tpu.core_type<tc>, window_params = [{transform_indices = @transform_0, window_bounds = array<i64: 128, 128>}, {pipeline_mode = #tpu.pipeline_mode<synchronous>, transform_indices = @transform_1, window_bounds = array<i64: 1, 128>}, {pipeline_mode = #tpu.pipeline_mode<synchronous>, transform_indices = @transform_2, window_bounds = array<i64: 128, 384>}, {transform_indices = @transform_3, window_bounds = array<i64: 128, 384>}]} {
    %c0 = arith.constant 0 : index
    %c0_0 = arith.constant 0 : index
    %0 = vector.load %arg1[%c0, %c0_0] : memref<128x128xf32, #tpu.memory_space<vmem>>, vector<128x128xf32>
    %1 = arith.mulf %0, %0 : vector<128x128xf32>
    %cst = arith.constant dense<0.000000e+00> : vector<128xf32>
    %2 = vector.multi_reduction <add>, %1, %cst [1] : vector<128x128xf32> to vector<128xf32>
    %3 = vector.shape_cast %2 : vector<128xf32> to vector<128x1xf32>
    %cst_1 = arith.constant 1.280000e+02 : f32
    %4 = vector.broadcast %cst_1 : f32 to vector<128x1xf32>
    %5 = arith.divf %3, %4 : vector<128x1xf32>
    %cst_2 = arith.constant 9.99999974E-6 : f32
    %6 = vector.broadcast %cst_2 : f32 to vector<128x1xf32>
    %7 = arith.addf %5, %6 : vector<128x1xf32>
    %8 = math.rsqrt %7 : vector<128x1xf32>
    %9 = vector.broadcast %8 : vector<128x1xf32> to vector<128x128xf32>
    %10 = arith.mulf %0, %9 : vector<128x128xf32>
    %c0_3 = arith.constant 0 : index
    %c0_4 = arith.constant 0 : index
    %11 = vector.load %arg2[%c0_3, %c0_4] : memref<1x128xf32, #tpu.memory_space<vmem>>, vector<1x128xf32>
    %12 = vector.broadcast %11 : vector<1x128xf32> to vector<128x128xf32>
    %13 = arith.mulf %10, %12 : vector<128x128xf32>
    %14 = arith.truncf %13 : vector<128x128xf32> to vector<128x128xbf16>
    %c0_5 = arith.constant 0 : index
    %c0_6 = arith.constant 0 : index
    %15 = vector.load %arg3[%c0_5, %c0_6] : memref<128x384xbf16, #tpu.memory_space<vmem>>, vector<128x384xbf16>
    %cst_7 = arith.constant dense<0.000000e+00> : vector<128x384xf32>
    %16 = tpu.matmul %14, %15, %cst_7 {dimension_numbers = #tpu.dot_dimension_numbers<[1], [0], [0], [1], [0, 0, 1, 1], [], []>} : vector<128x128xbf16>, vector<128x384xbf16>, vector<128x384xf32> -> vector<128x384xf32>
    %c0_8 = arith.constant 0 : index
    %c0_9 = arith.constant 0 : index
    %17 = vector.load %arg4[%c0_8, %c0_9] : memref<128x384xf32, #tpu.memory_space<vmem>>, vector<128x384xf32>
    tpu.vector_store %arg4[%c0_8, %c0_9], %16 {strides = array<i32>} : memref<128x384xf32, #tpu.memory_space<vmem>>, vector<128x384xf32>,
    return
  }
  func.func @transform_0(%arg0: i32) -> (i32, i32) {
    %c0_i32 = arith.constant 0 : i32
    %c0_i32_0 = arith.constant 0 : i32
    return %arg0, %c0_i32 : i32, i32
  }
  func.func @transform_1(%arg0: i32) -> (i32, i32) {
    %c0_i32 = arith.constant 0 : i32
    %c0_i32_0 = arith.constant 0 : i32
    %c0_i32_1 = arith.constant 0 : i32
    return %c0_i32, %c0_i32_0 : i32, i32
  }
  func.func @transform_2(%arg0: i32) -> (i32, i32) {
    %c0_i32 = arith.constant 0 : i32
    %c0_i32_0 = arith.constant 0 : i32
    %c0_i32_1 = arith.constant 0 : i32
    return %c0_i32, %c0_i32_0 : i32, i32
  }
  func.func @transform_3(%arg0: i32) -> (i32, i32) {
    %c0_i32 = arith.constant 0 : i32
    %c0_i32_0 = arith.constant 0 : i32
    return %arg0, %c0_i32 : i32, i32
  }
}

</mosaic_0001>

<bundles_post_ra>
// kernel: tpu_custom_call.1
= control target key start
LH: loop header
LB: loop body
LE: loop exit
PB: predicated region body
PF: predicated region fallthrough
CT: control target
= control target key end

     0   :  { %s2128_s0 = inlined_call_operand.hbm [shape: f32[256,128], index: 0, kind: input, shape index: {}]   ;;  %s2129_s1 = inlined_call_operand.hbm [shape: f32[1,128], index: 1, kind: input, shape index: {}]   ;;  %s2130_s2 = inlined_call_operand.hbm [shape: bf16[128,384], index: 2, kind: input, shape index: {}]   ;;  %s2131_s3 = inlined_call_operand.hbm [shape: f32[256,384], index: 3, kind: output, shape index: {}]  }
   0x1   :  { %2132 = sst [smem:[#allocation12_spill]] %s2129_s1 }
   0x2   :  { %8 = vsyncpa [#allocation3], 0 }
   0x3   :  { %10 = vsyncpa [#allocation3 + $0x1], 0 }
   0x4   :  { %11 = vsyncpa [#allocation6], 0 }
   0x5   :  { %12 = vsyncpa [#allocation4], 0 }
   0x6   :  { %14 = vsyncpa [#allocation4 + $0x1], 0  ;;  %s1459_s12 = smov 0   ;;  %s1461_s13 = smov 0  }
   0x7   :  { %s1463_s14 = smov 0   ;;  %s1465_s15 = smov 0  }
   0x8 LB: > { %s1480_s16 = sadd.s32 4294967295, %s1428_s15   ;;  %s995_s17 = sadd.s32 4294967294, %s1428_s15   ;;  %s1428_s15 = sphi %s1465_s15, %s2166_s15   ;;  %s1424_s14 = sphi %s1463_s14, %s2165_s14   ;;  %s1420_s13 = sphi %s1461_s13, %s2164_s13   ;;  %s1416_s12 = sphi %s1459_s12, %s2163_s12  }
   0x9   : > { %s1484_s18 = sadd.s32 1, %s1428_s15   ;;  %s27_s19 = sadd.s32 1, %s1424_s14 }
   0xa   : > { %s24_s20 = ssub.s32 %s1428_s15, %s1484_s18  ;;  %p34_p0 = scmp.ne.s32.totalorder %s1424_s14, %s1420_s13 }
   0xb   : > { %p25_p1 = scmp.eq.s32.totalorder %s24_s20, 0  ;;  %p35_p2 = scmp.eq.s32.totalorder %s1428_s15, 0 }
   0xc   : > { %p40_p3 = scmp.ne.s32.totalorder %s1420_s13, %s1416_s12  ;;  %p41_p4 = scmp.eq.s32.totalorder %s1480_s16, 0 }
   0xd   : > { %s1496_s21 = scalar_select %p25_p1, %s1424_s14, %s27_s19  }
   0xe   : > { %p1498_p5 = por %p35_p2, %p34_p0  ;;  %p1504_p6 = por %p41_p4, %p40_p3 }
   0xf   : > { %p106_p7 = scmp.eq.s32.totalorder %s1480_s16, 1  ;;  %p112_p8 = scmp.eq.s32.totalorder %s995_s17, 1 }
  0x10   : > { %p996_p9 = scmp.ge.s32.totalorder %s1428_s15, 1  ;;  %p119_p10 = scmp.lt.s32.totalorder %s1428_s15, 3 }
  0x11   : > { %p1511_p11 = por %p106_p7, %p34_p0  ;;  %p1515_p12 = por %p112_p8, %p40_p3 }
  0x12   : > { %p1519_p13 = pnand %p996_p9, %p119_p10  ;;  %s2138_s1 = sld [smem:[#allocation12_spill]] }
  0x13   : > { %s1430_s30 = smov [#allocation5]   ;;  %p1188_p3 = scmp.lt.s32.totalorder %s1428_s15, 2 }
  0x14   : > { %p1171_p1 = pneg %p1519_p13  ;;  %s133_s4 = sshll.u32 %s1430_s30, 4  ;;  %s134_s4 = int_to_ptr.vmem [resolvable:$true] %s133_s4 }
  0x15   : > { %s142_s7 = sshll.u32 %s2130_s2, 4  ;;  %p1537_p7 = pnand %p1188_p3, %p1498_p5  ;;  %s143_s7 = int_to_ptr.hbm [resolvable:$true] %s142_s7 }
  0x16   : > { %p1172_p2 = pnand %p1171_p1, %p41_p4  ;;  %s1431_s9 = smov [#allocation7]  }
  0x17   : > { %s144_s10 = sshll.u32 %s1431_s9, 4  ;;  %s158_s11 = sand.u32 1, %s1424_s14   ;;  %s145_s10 = int_to_ptr.vmem [resolvable:$true] %s144_s10 }
  0x18   : > { %s131_s29 = sshll.u32 %s2138_s1, 4  ;;  %s1432_s17 = smov 192   ;;  %s132_s29 = int_to_ptr.hbm [resolvable:$true] %s131_s29 }
  0x19   : > { %1174 = dma.hbm_to_vmem [thread:$0]  (!%p1172_p2), %s132_s29, 16, %s134_s4, [#allocation6]  }
  0x1a   : > { %s1433_s19 = smov 12   ;;  %s1000_s20 = sshll.u32 %s158_s11, 7 }
  0x1b   : > { %1177 = dma.hbm_to_vmem [thread:$0]  (!%p1172_p2), %s143_s7, 3072, %s145_s10, [#allocation6], %s1432_s17, %s1432_s17, %s1433_s19  }
  0x1c   : > { %s1108_s27 = sshll.u32 %s1428_s15, 7  ;;  %s162_s29 = scalar_lea.vmem [#allocation2], %s1000_s20 }
  0x1d   : > { %s167_s5 = scalar_lea.hbm %s2128_s0, %s1108_s27  ;;  %s170_s22 = sshll.u32 %s162_s29, 4  ;;  %s171_s22 = int_to_ptr.vmem [resolvable:$true] %s170_s22 }
  0x1e   : > { %s168_s4 = sshll.u32 %s167_s5, 4  ;;  %s159_s6 = scalar_lea.sflag [#allocation3], %s158_s11  ;;  %s169_s4 = int_to_ptr.hbm [resolvable:$true] %s168_s4 }
  0x1f   : > { %s1328_s1 = sshra.s32 %s169_s4, 4  ;;  %p1332_p8 = pneg %p1537_p7  ;;  %s1329_s1 = int_to_ptr.hbm [resolvable:$true] %s1328_s1 }
  0x20   : > { %s1330_s9 = scalar_lea.hbm %s1329_s1, 128  ;;  %s1335_s17 = scalar_lea.hbm %s2128_s0, 256 }
  0x21   : > { %p1331_p5 = scmp.ne.s32.totalorder %s1329_s1, %s1330_s9  ;;  %p1336_p1 = scmp.lt.s32.totalorder %s1329_s1, %s2128_s0 }
  0x22   : > { %p1337_p2 = scmp.lt.s32.totalorder %s1335_s17, %s1330_s9 }
  0x23   : > { %p1333_p9 = pnand %p1332_p8, %p1331_p5 }
  0x24   : > { %p1338_p3 = por %p1337_p2, %p1336_p1 }
  0x25   : > { %p1334_p10 = pneg %p1333_p9 }
  0x27   : > { %p1339_p0 = pnand %p1338_p3, %p1334_p10 }
  0x29   : > { %1342 = shalt.err (!%p1339_p0)
}
  0x2a   : > { %s1434_s11 = smov 128   ;;  %s1435_s20 = smov 8  }
  0x2b   : > { %1181 = dma.hbm_to_vmem [thread:$0]  (!%p1537_p7), %s169_s4, 2048, %s171_s22, %s159_s6, %s1434_s11, %s1434_s11, %s1435_s20  }
  0x2c   : > { %182 = sbr.rel (%p1519_p13) target bundleno = 434 (0x1b2), region = 32  ;;  %s1559_s28 = sand.u32 (!%p1519_p13), 1, %s1420_s13  }
  0x2d   : > { %s1004_s30 = sshll.u32 (!%p1519_p13), %s1559_s28, 7  ;;  %s185_s1 = scalar_lea.sflag (!%p1519_p13), [#allocation3], %s1559_s28 }
  0x2e   : > { %s1563_s5 = scalar_lea.vmem (!%p1519_p13), [#allocation2], %s1004_s30 }
  0x31   : > { %1403 = dma.done.wait (%p1504_p6), %s185_s1, 2048  }
  0x32   : > { %1405 = vsyncadd (%p1504_p6), %s185_s1, 4294965248 }
  0x33   : > { %1407 = dma.done.wait (%p41_p4), [#allocation6], 3088  }
  0x34   : > { %1409 = vsyncadd (%p41_p4), [#allocation6], 4294964208  ;;  %v1574_v0 = vld [vmem:[%s1563_s5 + $0x60] sm:$0xff]  ;;  %v1577_v1 = vld [vmem:[%s1563_s5 + $0x10] sm:$0xff]  ;;  %v1436_v32 = vmov 128.0   ;;  %s1157_s23 = smul.u32 384, %s1559_s28 }
  0x35   : > { %v1580_v2 = vld [vmem:[%s1563_s5] sm:$0xff]  ;;  %v252_v3 = vmul.f32 %v1574_v0, %v1574_v0  ;;  %v242_v4 = vmul.f32 %v1577_v1, %v1577_v1  ;;  %v1589_v6 = vld [vmem:[%s1563_s5 + $0x68] sm:$0xff]  ;;  %v1592_v7 = vld [vmem:[%s1563_s5 + $0x18] sm:$0xff]  ;;  %1234 = vrcp.f32 %v1436_v32  ;;  %s1158_s8 = smul.u32 384, %s1480_s16  ;;  %s887_s16 = scalar_lea.sflag [#allocation4], %s1559_s28 }
  0x36   : > { %v240_v5 = vmul.f32 %v1580_v2, %v1580_v2  ;;  %v1595_v8 = vld [vmem:[%s1563_s5 + $0x8] sm:$0xff]  ;;  %v253_v9 = vmul.f32 %v1589_v6, %v1589_v6  ;;  %v243_v10 = vmul.f32 %v1592_v7, %v1592_v7  ;;  %v1604_v12 = vld [vmem:[%s1563_s5 + $0x78] sm:$0xff]  ;;  %v1607_v13 = vld [vmem:[%s1563_s5 + $0x20] sm:$0xff]  ;;  %s2044_s26 = scalar_lea.vmem [#allocation8], %s1157_s23  ;;  %s1378_s27 = scalar_lea.hbm %s2131_s3, 768 }
  0x37   : > { %280 = vadd.xlane.f32.xlu1 %v252_v3  ;;  %260 = vadd.xlane.f32.xlu2 %v242_v4  ;;  %v241_v11 = vmul.f32 %v1595_v8, %v1595_v8  ;;  %v1610_v14 = vld [vmem:[%s1563_s5 + $0x70] sm:$0xff]  ;;  %v255_v15 = vmul.f32 %v1604_v12, %v1604_v12  ;;  %v244_v16 = vmul.f32 %v1607_v13, %v1607_v13  ;;  %v1622_v19 = vld [vmem:[%s1563_s5 + $0x38] sm:$0xff]  ;;  %v1625_v20 = vld [vmem:[%s1563_s5 + $0x28] sm:$0xff]  ;;  %s899_s4 = scalar_lea.hbm %s2131_s3, %s1158_s8  ;;  %s900_s6 = sshll.u32 %s2044_s26, 4  ;;  %s901_s6 = int_to_ptr.vmem [resolvable:$true] %s900_s6 }
  0x38   : > { %256 = vadd.xlane.f32.xlu0 %v240_v5  ;;  %v254_v17 = vmul.f32 %v1610_v14, %v1610_v14  ;;  %v1619_v18 = vld [vmem:[%s1563_s5 + $0x30] sm:$0xff]  ;;  %v247_v22 = vmul.f32 %v1622_v19, %v1622_v19  ;;  %v245_v23 = vmul.f32 %v1625_v20, %v1625_v20  ;;  %v1634_v24 = vld [vmem:[%s1563_s5 + $0x48] sm:$0xff]  ;;  %v1640_v26 = vld [vmem:[%s1563_s5 + $0x40] sm:$0xff]  ;;  %s902_s9 = sshll.u32 %s899_s4, 4  ;;  %s903_s9 = int_to_ptr.hbm [resolvable:$true] %s902_s9 }
  0x39   : > { %v246_v21 = vmul.f32 %v1619_v18, %v1619_v18  ;;  %v1637_v25 = vld [vmem:[%s1563_s5 + $0x50] sm:$0xff]  ;;  %v249_v27 = vmul.f32 %v1634_v24, %v1634_v24  ;;  %v248_v29 = vmul.f32 %v1640_v26, %v1640_v26  ;;  %v1649_v30 = vld [vmem:[%s1563_s5 + $0x58] sm:$0xff]  ;;  %v1093_v33 = vld [vmem:[#allocation7 + $0xa8] sm:$0xf]  ;;  %s1372_s7 = sshra.s32 %s903_s9, 4  ;;  %s1373_s7 = int_to_ptr.hbm [resolvable:$true] %s1372_s7 }
  0x3a   : > { %v250_v28 = vmul.f32 %v1637_v25, %v1637_v25  ;;  %v251_v31 = vmul.f32 %v1649_v30, %v1649_v30  ;;  %v1131_v34 = vld [vmem:[#allocation7 + $0xb0] sm:$0xf0]  ;;  %v1130_v35 = vld [vmem:[#allocation7 + $0xac] sm:$0xf]  ;;  %v1095_v37 = vld [vmem:[#allocation7 + $0xb4] sm:$0xf0]  ;;  %p1379_p0 = scmp.lt.s32.totalorder %s1373_s7, %s2131_s3 }
  0x3b   : > { %v1094_v36 = vor.u32 %v1131_v34, %v1093_v33  ;;  %v1101_v38 = vld [vmem:[#allocation7 + $0xb0] sm:$0xf]  ;;  %v1132_v39 = vld [vmem:[#allocation7 + $0xb8] sm:$0xf0]  ;;  %v1653_v40 = vor.u32 %v1130_v35, %v1095_v37  ;;  %v1659_v42 = vpop.eup %1234  ;;  %v1127_v45 = vld [vmem:[#allocation7 + $0x94] sm:$0xf] }
  0x3c   : > { %v1655_v41 = vor.u32 %v1132_v39, %v1101_v38  ;;  %v1081_v43 = vld [vmem:[#allocation7 + $0x90] sm:$0xf]  ;;  %v1128_v44 = vld [vmem:[#allocation7 + $0x98] sm:$0xf0]  ;;  %v1083_v47 = vld [vmem:[#allocation7 + $0x9c] sm:$0xf0]  ;;  %vm293_vm0 = vweird.f32 %v1659_v42 }
  0x3d   : > { %691 = vmatpush.bf16.msra.mxu0 %v1094_v36  ;;  %1133 = vmatpush.bf16.msra.mxu3 %v1094_v36  ;;  %v1082_v46 = vor.u32 %v1128_v44, %v1081_v43  ;;  %v1089_v48 = vld [vmem:[#allocation7 + $0x98] sm:$0xf]  ;;  %v1129_v49 = vld [vmem:[#allocation7 + $0xa0] sm:$0xf0]  ;;  %v1661_v50 = vor.u32 %v1127_v45, %v1083_v47  ;;  %v289_v52 = vmul.f32 128.0, %v1659_v42  ;;  %s1374_s10 = scalar_lea.hbm %s1373_s7, 384 }
  0x3e   : > { %740 = vmatpush.bf16.msra.mxu1 %v1653_v40  ;;  %789 = vmatpush.bf16.msra.mxu2 %v1655_v41  ;;  %v1663_v51 = vor.u32 %v1129_v49, %v1089_v48  ;;  %v1069_v53 = vld [vmem:[#allocation7 + $0x78] sm:$0xf]  ;;  %v1125_v54 = vld [vmem:[#allocation7 + $0x80] sm:$0xf0]  ;;  %v1124_v55 = vld [vmem:[#allocation7 + $0x7c] sm:$0xf]  ;;  %p1375_p4 = scmp.ne.s32.totalorder %s1373_s7, %s1374_s10  ;;  %p1380_p7 = scmp.lt.s32.totalorder %s1378_s27, %s1374_s10 }
  0x3f   : > { %282 = vadd.xlane.f32.xlu1 %v253_v9  ;;  %262 = vadd.xlane.f32.xlu2 %v243_v10  ;;  %v1070_v56 = vor.u32 %v1125_v54, %v1069_v53  ;;  %v1071_v57 = vld [vmem:[#allocation7 + $0x84] sm:$0xf0]  ;;  %v1077_v58 = vld [vmem:[#allocation7 + $0x80] sm:$0xf]  ;;  %v1126_v59 = vld [vmem:[#allocation7 + $0x88] sm:$0xf0] }
  0x40   : > { %258 = vadd.xlane.f32.xlu0 %v241_v11  ;;  %v1668_v60 = vor.u32 %v1124_v55, %v1071_v57  ;;  %v1670_v61 = vor.u32 %v1126_v59, %v1077_v58  ;;  %v290_v62 = vsub.f32 1.0, %v289_v52  ;;  %v1057_v63 = vld [vmem:[#allocation7 + $0x60] sm:$0xf]  ;;  %v1122_v3 = vld [vmem:[#allocation7 + $0x68] sm:$0xf0]  ;;  %p1376_p6 = pnand %p1375_p4, %p1511_p11  ;;  %p1381_p5 = por %p1380_p7, %p1379_p0 }
  0x41   : > { %692 = vmatpush.bf16.msra.mxu0 %v1082_v46  ;;  %1134 = vmatpush.bf16.msra.mxu3 %v1082_v46  ;;  %v1121_v4 = vld [vmem:[#allocation7 + $0x64] sm:$0xf]  ;;  %v1058_v5 = vor.u32 %v1122_v3, %v1057_v63  ;;  %v1059_v9 = vld [vmem:[#allocation7 + $0x6c] sm:$0xf0]  ;;  %v1065_v10 = vld [vmem:[#allocation7 + $0x68] sm:$0xf] }
  0x42   : > { %741 = vmatpush.bf16.msra.mxu1 %v1661_v50  ;;  %790 = vmatpush.bf16.msra.mxu2 %v1663_v51  ;;  %v1123_v11 = vld [vmem:[#allocation7 + $0x70] sm:$0xf0]  ;;  %v1033_v35 = vld [vmem:[#allocation7 + $0x30] sm:$0xf]  ;;  %v1116_v36 = vld [vmem:[#allocation7 + $0x38] sm:$0xf0]  ;;  %p1377_p13 = pneg %p1376_p6 }
  0x43   : > { %v1115_v37 = vld [vmem:[#allocation7 + $0x34] sm:$0xf]  ;;  %v1034_v38 = vor.u32 %v1116_v36, %v1033_v35  ;;  %v1035_v39 = vld [vmem:[#allocation7 + $0x3c] sm:$0xf0]  ;;  %v1041_v43 = vld [vmem:[#allocation7 + $0x38] sm:$0xf] }
  0x44   : > { %v1117_v44 = vld [vmem:[#allocation7 + $0x40] sm:$0xf0]  ;;  %v1692_v46 = vor.u32 %v1115_v37, %v1035_v39  ;;  %v1021_v52 = vld [vmem:[#allocation7 + $0x18] sm:$0xf]  ;;  %v1112_v54 = vld [vmem:[#allocation7 + $0x1c] sm:$0xf]  ;;  %p1382_p8 = pnand %p1381_p5, %p1377_p13 }
  0x45   : > { %693 = vmatpush.bf16.msra.mxu0 %v1070_v56  ;;  %1135 = vmatpush.bf16.msra.mxu3 %v1070_v56  ;;  %v1694_v47 = vor.u32 %v1117_v44, %v1041_v43  ;;  %v1113_v53 = vld [vmem:[#allocation7 + $0x20] sm:$0xf0]  ;;  %v1023_v58 = vld [vmem:[#allocation7 + $0x24] sm:$0xf0]  ;;  %v1029_v59 = vld [vmem:[#allocation7 + $0x20] sm:$0xf] }
  0x46   : > { %742 = vmatpush.bf16.msra.mxu1 %v1668_v60  ;;  %791 = vmatpush.bf16.msra.mxu2 %v1670_v61  ;;  %v1022_v57 = vor.u32 %v1113_v53, %v1021_v52  ;;  %v1701_v3 = vor.u32 %v1112_v54, %v1023_v58 }
  0x47   : > { %286 = vadd.xlane.f32.xlu1 %v255_v15  ;;  %264 = vadd.xlane.f32.xlu2 %v244_v16  ;;  %v291_v15 = vmul.f32 %v1659_v42, %v290_v62  ;;  %v1675_v16 = vor.u32 %v1121_v4, %v1059_v9  ;;  %v1114_v62 = vld [vmem:[#allocation7 + $0x28] sm:$0xf0] }
  0x48   : > { %284 = vadd.xlane.f32.xlu0 %v254_v17  ;;  %v1677_v17 = vor.u32 %v1123_v11, %v1065_v10  ;;  %v1703_v4 = vor.u32 %v1114_v62, %v1029_v59  ;;  %v1009_v11 = vld [vmem:[#allocation7] sm:$0xf] }
  0x49   : > { %694 = vmatpush.bf16.msra.mxu0 %v1058_v5  ;;  %1136 = vmatpush.bf16.msra.mxu3 %v1058_v5  ;;  %v292_v32 = vadd.f32 %v1659_v42, %v291_v15  ;;  %v1110_v15 = vld [vmem:[#allocation7 + $0x8] sm:$0xf0] }
  0x4a   : > { %743 = vmatpush.bf16.msra.mxu1 %v1675_v16  ;;  %792 = vmatpush.bf16.msra.mxu2 %v1677_v17 }
  0x4b   : > { %v1690_v45 = vsel %vm293_vm0, %v1659_v42, %v292_v32 }
  0x4f   : > { %268 = vadd.xlane.f32.xlu1 %v246_v21  ;;  %270 = vadd.xlane.f32.xlu2 %v247_v22  ;;  %v1045_v21 = vld [vmem:[#allocation7 + $0x48] sm:$0xf]  ;;  %v1119_v22 = vld [vmem:[#allocation7 + $0x50] sm:$0xf0] }
  0x50   : > { %266 = vadd.xlane.f32.xlu0 %v245_v23  ;;  %v1118_v23 = vld [vmem:[#allocation7 + $0x4c] sm:$0xf] }
  0x57   : > { %274 = vadd.xlane.f32.xlu1 %v249_v27  ;;  %276 = vadd.xlane.f32.xlu2 %v250_v28  ;;  %v1046_v27 = vor.u32 %v1119_v22, %v1045_v21  ;;  %v1047_v28 = vld [vmem:[#allocation7 + $0x54] sm:$0xf0]  ;;  %v1010_v21 = vor.u32 %v1110_v15, %v1009_v11  ;;  %v1109_v22 = vld [vmem:[#allocation7 + $0x4] sm:$0xf] }
  0x58   : > { %272 = vadd.xlane.f32.xlu0 %v248_v29  ;;  %v1053_v29 = vld [vmem:[#allocation7 + $0x50] sm:$0xf]  ;;  %v1682_v33 = vor.u32 %v1118_v23, %v1047_v28 }
  0x59   : > { %695 = vmatpush.bf16.msra.mxu0 %v1046_v27  ;;  %1137 = vmatpush.bf16.msra.mxu3 %v1046_v27  ;;  %v1011_v23 = vld [vmem:[#allocation7 + $0xc] sm:$0xf0]  ;;  %v1017_v27 = vld [vmem:[#allocation7 + $0x8] sm:$0xf] }
  0x5a   : > { %744 = vmatpush.bf16.msra.mxu1 %v1682_v33  ;;  %v1714_v28 = vor.u32 %v1109_v22, %v1011_v23 }
  0x5d   : > { %696 = vmatpush.bf16.msra.mxu0 %v1034_v38  ;;  %1138 = vmatpush.bf16.msra.mxu3 %v1034_v38 }
  0x5e   : > { %745 = vmatpush.bf16.msra.mxu1 %v1692_v46 }
  0x60   : > { %278 = vadd.xlane.f32.xlu0 %v251_v31  ;;  %v1120_v31 = vld [vmem:[#allocation7 + $0x58] sm:$0xf0] }
  0x61   : > { %v1684_v34 = vor.u32 %v1120_v31, %v1053_v29  ;;  %697 = vmatpush.bf16.msra.mxu0 %v1022_v57  ;;  %1139 = vmatpush.bf16.msra.mxu3 %v1022_v57  ;;  %v1111_v29 = vld [vmem:[#allocation7 + $0x10] sm:$0xf0] }
  0x62   : > { %746 = vmatpush.bf16.msra.mxu1 %v1701_v3  ;;  %v1717_v31 = vor.u32 %v1111_v29, %v1017_v27 }
  0x63   : > { %793 = vmatpush.bf16.msra.mxu2 %v1684_v34 }
  0x65   : > { %698 = vmatpush.bf16.msra.mxu0 %v1010_v21  ;;  %1140 = vmatpush.bf16.msra.mxu3 %v1010_v21 }
  0x66   : > { %747 = vmatpush.bf16.msra.mxu1 %v1714_v28 }
  0x67   : > { %794 = vmatpush.bf16.msra.mxu2 %v1694_v47 }
  0x69   : > { %1141 = vmatpush.bf16.msrb.mxu3 %v1653_v40 }
  0x6b   : > { %795 = vmatpush.bf16.msra.mxu2 %v1703_v4 }
  0x6d   : > { %1142 = vmatpush.bf16.msrb.mxu3 %v1661_v50 }
  0x6f   : > { %796 = vmatpush.bf16.msra.mxu2 %v1717_v31 }
  0x71   : > { %1143 = vmatpush.bf16.msrb.mxu3 %v1668_v60 }
  0x75   : > { %1144 = vmatpush.bf16.msrb.mxu3 %v1675_v16 }
  0x79   : > { %1145 = vmatpush.bf16.msrb.mxu3 %v1682_v33 }
  0x7d   : > { %1146 = vmatpush.bf16.msrb.mxu3 %v1692_v46 }
  0x81   : > { %1147 = vmatpush.bf16.msrb.mxu3 %v1701_v3 }
  0x85   : > { %1148 = vmatpush.bf16.msrb.mxu3 %v1714_v28 }
  0xaa   : > { %v281_v48 = vpop.xlane.xlu1 %280  ;;  %v261_v49 = vpop.xlane.xlu2 %260 }
  0xab   : > { %v307_v55 = vmul.f32 %v1690_v45, %v281_v48  ;;  %v297_v42 = vmul.f32 %v1690_v45, %v261_v49  ;;  %v257_v56 = vpop.xlane.xlu0 %256 }
  0xac   : > { %v295_v63 = vmul.f32 %v1690_v45, %v257_v56 }
  0xad   : > { %v1705_v5 = vadd.f32 1e-05, %v307_v55  ;;  %v1707_v9 = vadd.f32 1e-05, %v297_v42 }
  0xae   : > { %v1709_v10 = vadd.f32 1e-05, %v295_v63 }
  0xaf   : > { %1236 = vrsqrt.f32 %v1705_v5  ;;  %vm453_vm2 = vweird.f32 %v1705_v5  ;;  %vm353_vm10 = vweird.f32 %v1707_v9 }
  0xb0   : > { %1238 = vrsqrt.f32 %v1709_v10  ;;  %vm333_vm5 = vweird.f32 %v1709_v10 }
  0xb1   : > { %1240 = vrsqrt.f32 %v1707_v9 }
  0xb2   : > { %v283_v32 = vpop.xlane.xlu1 %282  ;;  %v263_v35 = vpop.xlane.xlu2 %262 }
  0xb3   : > { %v308_v36 = vmul.f32 %v1690_v45, %v283_v32  ;;  %v298_v37 = vmul.f32 %v1690_v45, %v263_v35  ;;  %v259_v38 = vpop.xlane.xlu0 %258 }
  0xb4   : > { %v296_v39 = vmul.f32 %v1690_v45, %v259_v38 }
  0xb5   : > { %v1726_v43 = vpop.eup %1236  ;;  %v1728_v44 = vadd.f32 1e-05, %v308_v36  ;;  %v1730_v48 = vadd.f32 1e-05, %v298_v37 }
  0xb6   : > { %v448_v49 = vmul.f32 %v1726_v43, %v1705_v5  ;;  %v1734_v52 = vadd.f32 1e-05, %v296_v39  ;;  %v1737_v40 = vpop.eup %1238  ;;  %vm454_vm1 = vweird.f32 %v1726_v43 }
  0xb7   : > { %1242 = vrsqrt.f32 %v1728_v44  ;;  %v1740_v53 = vpop.eup %1240  ;;  %v328_v55 = vmul.f32 %v1737_v40, %v1709_v10  ;;  %vm334_vm3 = vweird.f32 %v1737_v40  ;;  %vm1780_vm4 = vmor %vm453_vm2, %vm454_vm1  ;;  %vm463_vm6 = vweird.f32 %v1728_v44 }
  0xb8   : > { %v449_v54 = vmul.f32 %v1726_v43, %v448_v49  ;;  %1244 = vrsqrt.f32 %v1730_v48  ;;  %v348_v50 = vmul.f32 %v1740_v53, %v1707_v9  ;;  %vm1789_vm8 = vmor %vm333_vm5, %vm334_vm3  ;;  %vm343_vm12 = vweird.f32 %v1734_v52 }
  0xb9   : > { %1246 = vrsqrt.f32 %v1734_v52  ;;  %v329_v56 = vmul.f32 %v1737_v40, %v328_v55  ;;  %vm354_vm13 = vweird.f32 %v1740_v53  ;;  %vm363_vm14 = vweird.f32 %v1730_v48 }
  0xba   : > { %v450_v42 = vmul.f32 0.5, %v449_v54  ;;  %v287_v57 = vpop.xlane.xlu1 %286  ;;  %v265_v62 = vpop.xlane.xlu2 %264  ;;  %v349_v35 = vmul.f32 %v1740_v53, %v348_v50  ;;  %vm1854_vm3 = vmor %vm353_vm10, %vm354_vm13 }
  0xbb   : > { %v310_v58 = vmul.f32 %v1690_v45, %v287_v57  ;;  %v285_v59 = vpop.xlane.xlu0 %284  ;;  %v330_v11 = vmul.f32 0.5, %v329_v56  ;;  %v299_v60 = vmul.f32 %v1690_v45, %v265_v62 }
  0xbc   : > { %v451_v63 = vsub.f32 1.5, %v450_v42  ;;  %v309_v29 = vmul.f32 %v1690_v45, %v285_v59  ;;  %v350_v5 = vmul.f32 0.5, %v349_v35 }
  0xbd   : > { %v1243_v15 = vpop.eup %1242  ;;  %v1752_v21 = vadd.f32 1e-05, %v310_v58  ;;  %v331_v23 = vsub.f32 1.5, %v330_v11  ;;  %v1777_v56 = vadd.f32 1e-05, %v299_v60 }
  0xbe   : > { %v1754_v22 = vpop.eup %1244  ;;  %v458_v27 = vmul.f32 %v1243_v15, %v1728_v44  ;;  %v452_v37 = vmul.f32 %v1726_v43, %v451_v63  ;;  %v1775_v42 = vadd.f32 1e-05, %v309_v29  ;;  %vm464_vm7 = vweird.f32 %v1243_v15  ;;  %v1812_v60 = vld [vmem:[#allocation5] ss:$0 sm:$0xff] }
  0xbf   : > { %v1760_v32 = vpop.eup %1246  ;;  %v358_v36 = vmul.f32 %v1754_v22, %v1730_v48  ;;  %1248 = vrsqrt.f32 %v1752_v21  ;;  %v332_v16 = vmul.f32 %v1737_v40, %v331_v23  ;;  %vm465_vm11 = vmor %vm463_vm6, %vm464_vm7  ;;  %vm364_vm0 = vweird.f32 %v1754_v22 }
  0xc0   : > { %v459_v38 = vmul.f32 %v1243_v15, %v458_v27  ;;  %v338_v39 = vmul.f32 %v1760_v32, %v1734_v52  ;;  %v456_v58 = vsel %vm1780_vm4, %v1726_v43, %v452_v37  ;;  %1250 = vrsqrt.f32 %v1775_v42  ;;  %vm1866_vm4 = vmor %vm363_vm14, %vm364_vm0 }
  0xc1   : > { %v359_v49 = vmul.f32 %v1754_v22, %v358_v36  ;;  %v336_v10 = vsel %vm1789_vm8, %v1737_v40, %v332_v16  ;;  %vm344_vm9 = vweird.f32 %v1760_v32  ;;  %1252 = vrsqrt.f32 %v1777_v56 }
  0xc2   : > { %v460_v54 = vmul.f32 0.5, %v459_v38  ;;  %v339_v55 = vmul.f32 %v1760_v32, %v338_v39  ;;  %v499_v35 = vmul.f32 %v456_v58, %v1574_v0  ;;  %v269_v36 = vpop.xlane.xlu1 %268  ;;  %v487_v39 = vmul.f32 %v336_v10, %v1580_v2  ;;  %vm345_vm15 = vmor %vm343_vm12, %vm344_vm9 }
  0xc3   : > { %v267_v50 = vpop.xlane.xlu0 %266  ;;  %v360_v11 = vmul.f32 0.5, %v359_v49  ;;  %v351_v52 = vsub.f32 1.5, %v350_v5  ;;  %v301_v58 = vmul.f32 %v1690_v45, %v269_v36  ;;  %vm483_vm1 = vweird.f32 %v1752_v21 }
  0xc4   : > { %v461_v33 = vsub.f32 1.5, %v460_v54  ;;  %v340_v62 = vmul.f32 0.5, %v339_v55  ;;  %v300_v23 = vmul.f32 %v1690_v45, %v267_v50  ;;  %v271_v54 = vpop.xlane.xlu2 %270  ;;  %v519_v57 = vmul.f32 %v1812_v60, %v499_v35 }
  0xc5   : > { %v1794_v63 = vpop.eup %1248  ;;  %vm473_vm6 = vweird.f32 %v1775_v42  ;;  %vm373_vm9 = vweird.f32 %v1777_v56 }
  0xc6   : > { %v462_v43 = vmul.f32 %v1243_v15, %v461_v33  ;;  %v341_v27 = vsub.f32 1.5, %v340_v62  ;;  %v478_v29 = vmul.f32 %v1794_v63, %v1752_v21  ;;  %v1810_v40 = vadd.f32 1e-05, %v300_v23  ;;  %v1824_v0 = vpop.eup %1250 }
  0xc7   : > { %v468_v2 = vmul.f32 %v1824_v0, %v1775_v42  ;;  %v352_v62 = vmul.f32 %v1740_v53, %v351_v52  ;;  %vm484_vm2 = vweird.f32 %v1794_v63  ;;  %vm474_vm7 = vweird.f32 %v1824_v0 }
  0xc8   : > { %v466_v37 = vsel %vm465_vm11, %v1243_v15, %v462_v43  ;;  %v342_v38 = vmul.f32 %v1760_v32, %v341_v27  ;;  %v479_v46 = vmul.f32 %v1794_v63, %v478_v29  ;;  %1254 = vrsqrt.f32 %v1810_v40  ;;  %vm1879_vm5 = vmor %vm483_vm1, %vm484_vm2 }
  0xc9   : > { %v500_v44 = vmul.f32 %v466_v37, %v1589_v6  ;;  %v361_v15 = vsub.f32 1.5, %v360_v11  ;;  %v1833_v6 = vpop.eup %1252  ;;  %v469_v3 = vmul.f32 %v1824_v0, %v468_v2  ;;  %v356_v42 = vsel %vm1854_vm3, %v1740_v53, %v352_v62  ;;  %vm475_vm8 = vmor %vm473_vm6, %vm474_vm7 }
  0xca   : > { %v346_v16 = vsel %vm345_vm15, %v1760_v32, %v342_v38  ;;  %v480_v49 = vmul.f32 0.5, %v479_v46  ;;  %v507_v32 = vmul.f32 %v1812_v60, %v487_v39  ;;  %v368_v35 = vmul.f32 %v1833_v6, %v1777_v56  ;;  %v275_v28 = vpop.xlane.xlu1 %274 }
  0xcb   : > { %v488_v55 = vmul.f32 %v346_v16, %v1595_v8  ;;  %v520_v50 = vmul.f32 %v1812_v60, %v500_v44  ;;  %v302_v8 = vmul.f32 %v1690_v45, %v271_v54  ;;  %v273_v11 = vpop.xlane.xlu0 %272  ;;  %v362_v27 = vmul.f32 %v1754_v22, %v361_v15 }
  0xcc   : > { %v481_v5 = vsub.f32 1.5, %v480_v49  ;;  %v470_v29 = vmul.f32 0.5, %v469_v3  ;;  %v1872_v38 = vadd.f32 1e-05, %v301_v58  ;;  %v304_v21 = vmul.f32 %v1690_v45, %v275_v28  ;;  %v277_v52 = vpop.xlane.xlu2 %276 }
  0xcd   : > { %v508_v59 = vmul.f32 %v1812_v60, %v488_v55  ;;  %v1840_v33 = vpack.c.bf16 %v520_v50, %v519_v57  ;;  %v1885_v39 = vadd.f32 1e-05, %v302_v8  ;;  %v303_v44 = vmul.f32 %v1690_v45, %v273_v11 }
  0xce   : > { %v482_v10 = vmul.f32 %v1794_v63, %v481_v5  ;;  %v1848_v23 = vpop.eup %1254  ;;  %v471_v48 = vsub.f32 1.5, %v470_v29  ;;  %v366_v15 = vsel %vm1866_vm4, %v1754_v22, %v362_v27  ;;  %v369_v49 = vmul.f32 %v1833_v6, %v368_v35 }
  0xcf   : > { %v523_v36 = vpack.c.bf16 %v508_v59, %v507_v32  ;;  %729 = vmatmul.bf16.vlgmr.msra.gmra.mxu3 %v1840_v33  ;;  %v378_v37 = vmul.f32 %v1848_v23, %v1810_v40  ;;  %1256 = vrsqrt.f32 %v1872_v38  ;;  %v1902_v54 = vadd.f32 1e-05, %v304_v21 }
  0xd0   : > { %1149 = vmatpush.bf16.msra.mxu3 %v1655_v41  ;;  %v486_v41 = vsel %vm1879_vm5, %v1794_v63, %v482_v10  ;;  %v472_v16 = vmul.f32 %v1824_v0, %v471_v48  ;;  %v1904_v2 = vadd.f32 1e-05, %v303_v44  ;;  %1258 = vrsqrt.f32 %v1885_v39 }
  0xd1   : > { %699 = vmatmul.bf16.vlgmr.msra.gmra.mxu0 %v523_v36  ;;  %748 = vmatmul.bf16.vlgmr.msra.gmra.mxu1 %v523_v36  ;;  %v379_v63 = vmul.f32 %v1848_v23, %v378_v37  ;;  %v502_v22 = vmul.f32 %v486_v41, %v1604_v12  ;;  %v305_v55 = vmul.f32 %v1690_v45, %v277_v52  ;;  %v370_v5 = vmul.f32 0.5, %v369_v49 }
  0xd2   : > { %797 = vmatmul.bf16.vlgmr.msra.gmra.mxu2 %v523_v36  ;;  %v476_v53 = vsel %vm475_vm8, %v1824_v0, %v472_v16  ;;  %v490_v32 = vmul.f32 %v366_v15, %v1592_v7  ;;  %1260 = vrsqrt.f32 %v1902_v54  ;;  %v489_v3 = vmul.f32 %v356_v42, %v1577_v1 }
  0xd3   : > { %v501_v57 = vmul.f32 %v476_v53, %v1610_v14  ;;  %v279_v50 = vpop.xlane.xlu0 %278  ;;  %v380_v58 = vmul.f32 0.5, %v379_v63  ;;  %1262 = vrsqrt.f32 %v1904_v2  ;;  %v522_v12 = vmul.f32 %v1812_v60, %v502_v22 }
  0xd4   : > { %1150 = vmatpush.bf16.msra.mxu3 %v1663_v51  ;;  %v1919_v0 = vadd.f32 1e-05, %v305_v55  ;;  %v306_v14 = vmul.f32 %v1690_v45, %v279_v50  ;;  %v371_v8 = vsub.f32 1.5, %v370_v5  ;;  %v510_v62 = vmul.f32 %v1812_v60, %v490_v32 }
  0xd5   : > { %v521_v51 = vmul.f32 %v1812_v60, %v501_v57  ;;  %v1922_v59 = vpop.eup %1256  ;;  %v381_v1 = vsub.f32 1.5, %v380_v58  ;;  %vm383_vm10 = vweird.f32 %v1810_v40  ;;  %vm374_vm11 = vweird.f32 %v1833_v6 }
  0xd6   : > { %v1924_v7 = vpop.eup %1258  ;;  %1264 = vrsqrt.f32 %v1919_v0  ;;  %v388_v45 = vmul.f32 %v1922_v59, %v1872_v38  ;;  %v509_v11 = vmul.f32 %v1812_v60, %v489_v3  ;;  %vm384_vm12 = vweird.f32 %v1848_v23  ;;  %vm1949_vm13 = vmor %vm373_vm9, %vm374_vm11 }
  0xd7   : > { %v1937_v43 = vpack.c.bf16 %v522_v12, %v521_v51  ;;  %v398_v29 = vmul.f32 %v1924_v7, %v1885_v39  ;;  %v382_v37 = vmul.f32 %v1848_v23, %v381_v1  ;;  %vm1959_vm14 = vmor %vm383_vm10, %vm384_vm12  ;;  %vm423_vm15 = vweird.f32 %v1902_v54 }
  0xd8   : > { %1151 = vmatpush.bf16.msra.mxu3 %v1670_v61  ;;  %v1930_v61 = vadd.f32 1e-05, %v306_v14  ;;  %v1261_v10 = vpop.eup %1260  ;;  %v524_v36 = vpack.c.bf16 %v510_v62, %v509_v11  ;;  %v389_v21 = vmul.f32 %v1922_v59, %v388_v45  ;;  %vm413_vm1 = vweird.f32 %v1904_v2 }
  0xd9   : > { %v1263_v27 = vpop.eup %1262  ;;  %v418_v35 = vmul.f32 %v1261_v10, %v1902_v54  ;;  %v399_v44 = vmul.f32 %v1924_v7, %v398_v29  ;;  %vm424_vm0 = vweird.f32 %v1261_v10  ;;  %v386_v16 = vsel %vm1959_vm14, %v1848_v23, %v382_v37 }
  0xda   : > { %1266 = vrsqrt.f32 %v1930_v61  ;;  %v408_v28 = vmul.f32 %v1263_v27, %v1904_v2  ;;  %vm414_vm2 = vweird.f32 %v1263_v27  ;;  %v390_v53 = vmul.f32 0.5, %v389_v21  ;;  %vm1979_vm3 = vmor %vm423_vm15, %vm424_vm0 }
  0xdb   : > { %v419_v46 = vmul.f32 %v1261_v10, %v418_v35  ;;  %v400_v55 = vmul.f32 0.5, %v399_v44  ;;  %vm1984_vm4 = vmor %vm413_vm1, %vm414_vm2  ;;  %v492_v32 = vmul.f32 %v386_v16, %v1625_v20  ;;  %vm433_vm5 = vweird.f32 %v1919_v0 }
  0xdc   : > { %1152 = vmatpush.bf16.msra.mxu3 %v1677_v17  ;;  %v372_v17 = vmul.f32 %v1833_v6, %v371_v8  ;;  %v1955_v48 = vpop.eup %1264  ;;  %v409_v56 = vmul.f32 %v1263_v27, %v408_v28  ;;  %vm443_vm7 = vweird.f32 %v1930_v61  ;;  %v391_v45 = vsub.f32 1.5, %v390_v53 }
  0xdd   : > { %v420_v52 = vmul.f32 0.5, %v419_v46  ;;  %vm434_vm6 = vweird.f32 %v1955_v48  ;;  %v512_v8 = vmul.f32 %v1812_v60, %v492_v32  ;;  %v401_v11 = vsub.f32 1.5, %v400_v55 }
  0xde   : > { %v376_v40 = vsel %vm1949_vm13, %v1833_v6, %v372_v17  ;;  %v410_v42 = vmul.f32 0.5, %v409_v56  ;;  %vm2005_vm9 = vmor %vm433_vm5, %vm434_vm6  ;;  %vm393_vm11 = vweird.f32 %v1872_v38  ;;  %vm394_vm12 = vweird.f32 %v1922_v59 }
  0xdf   : > { %734 = vmatmul.bf16.gmra.mxu3 %v1937_v43  ;;  %v421_v49 = vsub.f32 1.5, %v420_v52  ;;  %v491_v23 = vmul.f32 %v376_v40, %v1607_v13  ;;  %vm403_vm13 = vweird.f32 %v1885_v39  ;;  %vm404_vm14 = vweird.f32 %v1924_v7  ;;  %vm395_vm15 = vmor %vm393_vm11, %vm394_vm12 }
  0xe0   : > { %1153 = vmatpush.bf16.msra.mxu3 %v1684_v34  ;;  %v428_v34 = vmul.f32 %v1955_v48, %v1919_v0  ;;  %v1267_v15 = vpop.eup %1266  ;;  %v411_v6 = vsub.f32 1.5, %v410_v42  ;;  %v392_v38 = vmul.f32 %v1922_v59, %v391_v45  ;;  %v402_v35 = vmul.f32 %v1924_v7, %v401_v11  ;;  %vm405_vm0 = vmor %vm403_vm13, %vm404_vm14 }
  0xe1   : > { %704 = vmatmul.bf16.gmra.mxu0 %v524_v36  ;;  %753 = vmatmul.bf16.gmra.mxu1 %v524_v36  ;;  %v438_v2 = vmul.f32 %v1267_v15, %v1930_v61  ;;  %v422_v57 = vmul.f32 %v1261_v10, %v421_v49  ;;  %vm444_vm8 = vweird.f32 %v1267_v15  ;;  %v511_v12 = vmul.f32 %v1812_v60, %v491_v23 }
  0xe2   : > { %802 = vmatmul.bf16.gmra.mxu2 %v524_v36  ;;  %v429_v63 = vmul.f32 %v1955_v48, %v428_v34  ;;  %vm2012_vm10 = vmor %vm443_vm7, %vm444_vm8  ;;  %v396_v36 = vsel %vm395_vm15, %v1922_v59, %v392_v38  ;;  %v406_v28 = vsel %vm405_vm0, %v1924_v7, %v402_v35 }
  0xe3   : > { %v439_v54 = vmul.f32 %v1267_v15, %v438_v2  ;;  %v426_v58 = vsel %vm1979_vm3, %v1261_v10, %v422_v57  ;;  %v525_v29 = vpack.c.bf16 %v512_v8, %v511_v12  ;;  %v494_v41 = vmul.f32 %v406_v28, %v1622_v19 }
  0xe4   : > { %1154 = vmatpush.bf16.msra.mxu3 %v1694_v47  ;;  %v430_v5 = vmul.f32 0.5, %v429_v63  ;;  %v412_v47 = vmul.f32 %v1263_v27, %v411_v6  ;;  %v496_v20 = vmul.f32 %v426_v58, %v1634_v24 }
  0xe5   : > { %v440_v51 = vmul.f32 0.5, %v439_v54 }
  0xe6   : > { %v431_v3 = vsub.f32 1.5, %v430_v5  ;;  %v416_v13 = vsel %vm1984_vm4, %v1263_v27, %v412_v47  ;;  %v516_v10 = vmul.f32 %v1812_v60, %v496_v20 }
  0xe7   : > { %v495_v14 = vmul.f32 %v416_v13, %v1640_v26 }
  0xe8   : > { %1155 = vmatpush.bf16.msra.mxu3 %v1703_v4  ;;  %v432_v62 = vmul.f32 %v1955_v48, %v431_v3  ;;  %v441_v4 = vsub.f32 1.5, %v440_v51 }
  0xe9   : > { %v515_v26 = vmul.f32 %v1812_v60, %v495_v14 }
  0xea   : > { %v442_v0 = vmul.f32 %v1267_v15, %v441_v4  ;;  %v436_v61 = vsel %vm2005_vm9, %v1955_v48, %v432_v62  ;;  %v493_v48 = vmul.f32 %v396_v36, %v1619_v18 }
  0xeb   : > { %v527_v27 = vpack.c.bf16 %v516_v10, %v515_v26  ;;  %v497_v39 = vmul.f32 %v436_v61, %v1637_v25  ;;  %v514_v25 = vmul.f32 %v1812_v60, %v494_v41 }
  0xec   : > { %1156 = vmatpush.bf16.msra.mxu3 %v1717_v31  ;;  %v446_v31 = vsel %vm2012_vm10, %v1267_v15, %v442_v0  ;;  %v513_v21 = vmul.f32 %v1812_v60, %v493_v48 }
  0xed   : > { %v498_v17 = vmul.f32 %v446_v31, %v1649_v30  ;;  %v517_v9 = vmul.f32 %v1812_v60, %v497_v39 }
  0xee   : > { %v526_v56 = vpack.c.bf16 %v514_v25, %v513_v21 }
  0xef   : > { %778 = vmatmul.bf16.vlgmr.msrb.gmra.mxu3 %v1840_v33  ;;  %v518_v37 = vmul.f32 %v1812_v60, %v498_v17 }
  0xf1   : > { %709 = vmatmul.bf16.gmra.mxu0 %v525_v29  ;;  %758 = vmatmul.bf16.gmra.mxu1 %v525_v29  ;;  %v528_v46 = vpack.c.bf16 %v518_v37, %v517_v9 }
  0xf2   : > { %807 = vmatmul.bf16.gmra.mxu2 %v525_v29 }
  0xff   : > { %783 = vmatmul.bf16.gmra.mxu3 %v1937_v43 }
 0x101   : > { %714 = vmatmul.bf16.gmra.mxu0 %v526_v56  ;;  %763 = vmatmul.bf16.gmra.mxu1 %v526_v56 }
 0x102   : > { %812 = vmatmul.bf16.gmra.mxu2 %v526_v56 }
 0x10f   : > { %827 = vmatmul.bf16.vlgmr.msra.gmra.mxu3 %v1840_v33 }
 0x111   : > { %719 = vmatmul.bf16.gmra.mxu0 %v527_v27  ;;  %768 = vmatmul.bf16.gmra.mxu1 %v527_v27 }
 0x112   : > { %817 = vmatmul.bf16.gmra.mxu2 %v527_v27 }
 0x11f   : > { %832 = vmatmul.bf16.gmra.mxu3 %v1937_v43 }
 0x121   : > { %724 = vmatmul.bf16.gmra.mxu0 %v528_v46  ;;  %773 = vmatmul.bf16.gmra.mxu1 %v528_v46 }
 0x122   : > { %822 = vmatmul.bf16.gmra.mxu2 %v528_v46 }
 0x14e   : > { %v700_v18 = vpop.f32.mrf.mxu0  ;;  %v749_v19 = vpop.f32.mrf.mxu1 }
 0x14f   : > { %838 = vst [vmem:[%s2044_s26] sm:$0xff] %v700_v18 }
 0x150   : > { %839 = vst [vmem:[%s2044_s26 + $0x8] sm:$0xff] %v749_v19 }
 0x152   : > { %v730_v30 = vpop.f32.mrf.mxu3 }
 0x153   : > { %874 = vst [vmem:[%s2044_s26 + $0x120] sm:$0xff] %v730_v30 }
 0x155   : > { %v798_v60 = vpop.f32.mrf.mxu2 }
 0x156   : > { %840 = vst [vmem:[%s2044_s26 + $0x10] sm:$0xff] %v798_v60  ;;  %v702_v33 = vpop.f32.mrf.mxu0  ;;  %v751_v59 = vpop.f32.mrf.mxu1 }
 0x157   : > { %841 = vst [vmem:[%s2044_s26 + $0x18] sm:$0xff] %v702_v33 }
 0x158   : > { %842 = vst [vmem:[%s2044_s26 + $0x20] sm:$0xff] %v751_v59 }
 0x15a   : > { %v732_v7 = vpop.f32.mrf.mxu3 }
 0x15b   : > { %877 = vst [vmem:[%s2044_s26 + $0x138] sm:$0xff] %v732_v7 }
 0x15d   : > { %v800_v43 = vpop.f32.mrf.mxu2 }
 0x15e   : > { %843 = vst [vmem:[%s2044_s26 + $0x28] sm:$0xff] %v800_v43  ;;  %v705_v44 = vpop.f32.mrf.mxu0  ;;  %v754_v52 = vpop.f32.mrf.mxu1 }
 0x15f   : > { %844 = vst [vmem:[%s2044_s26 + $0x30] sm:$0xff] %v705_v44 }
 0x160   : > { %845 = vst [vmem:[%s2044_s26 + $0x38] sm:$0xff] %v754_v52 }
 0x162   : > { %v735_v34 = vpop.f32.mrf.mxu3 }
 0x163   : > { %880 = vst [vmem:[%s2044_s26 + $0x150] sm:$0xff] %v735_v34 }
 0x165   : > { %v803_v40 = vpop.f32.mrf.mxu2 }
 0x166   : > { %846 = vst [vmem:[%s2044_s26 + $0x40] sm:$0xff] %v803_v40  ;;  %v707_v42 = vpop.f32.mrf.mxu0  ;;  %v756_v15 = vpop.f32.mrf.mxu1 }
 0x167   : > { %847 = vst [vmem:[%s2044_s26 + $0x48] sm:$0xff] %v707_v42 }
 0x168   : > { %848 = vst [vmem:[%s2044_s26 + $0x50] sm:$0xff] %v756_v15 }
 0x16a   : > { %v737_v16 = vpop.f32.mrf.mxu3 }
 0x16b   : > { %883 = vst [vmem:[%s2044_s26 + $0x168] sm:$0xff] %v737_v16 }
 0x16d   : > { %v805_v49 = vpop.f32.mrf.mxu2 }
 0x16e   : > { %849 = vst [vmem:[%s2044_s26 + $0x58] sm:$0xff] %v805_v49  ;;  %v710_v63 = vpop.f32.mrf.mxu0  ;;  %v759_v53 = vpop.f32.mrf.mxu1 }
 0x16f   : > { %850 = vst [vmem:[%s2044_s26 + $0x60] sm:$0xff] %v710_v63 }
 0x170   : > { %851 = vst [vmem:[%s2044_s26 + $0x68] sm:$0xff] %v759_v53 }
 0x172   : > { %v779_v22 = vpop.f32.mrf.mxu3 }
 0x173   : > { %875 = vst [vmem:[%s2044_s26 + $0x128] sm:$0xff] %v779_v22 }
 0x175   : > { %v808_v6 = vpop.f32.mrf.mxu2 }
 0x176   : > { %852 = vst [vmem:[%s2044_s26 + $0x70] sm:$0xff] %v808_v6  ;;  %v712_v2 = vpop.f32.mrf.mxu0  ;;  %v761_v55 = vpop.f32.mrf.mxu1 }
 0x177   : > { %853 = vst [vmem:[%s2044_s26 + $0x78] sm:$0xff] %v712_v2 }
 0x178   : > { %854 = vst [vmem:[%s2044_s26 + $0x80] sm:$0xff] %v761_v55 }
 0x17a   : > { %v781_v57 = vpop.f32.mrf.mxu3 }
 0x17b   : > { %878 = vst [vmem:[%s2044_s26 + $0x140] sm:$0xff] %v781_v57 }
 0x17d   : > { %v810_v50 = vpop.f32.mrf.mxu2 }
 0x17e   : > { %855 = vst [vmem:[%s2044_s26 + $0x88] sm:$0xff] %v810_v50  ;;  %v715_v23 = vpop.f32.mrf.mxu0  ;;  %v764_v5 = vpop.f32.mrf.mxu1 }
 0x17f   : > { %856 = vst [vmem:[%s2044_s26 + $0x90] sm:$0xff] %v715_v23 }
 0x180   : > { %857 = vst [vmem:[%s2044_s26 + $0x98] sm:$0xff] %v764_v5 }
 0x182   : > { %v784_v47 = vpop.f32.mrf.mxu3 }
 0x183   : > { %881 = vst [vmem:[%s2044_s26 + $0x158] sm:$0xff] %v784_v47 }
 0x185   : > { %v813_v32 = vpop.f32.mrf.mxu2 }
 0x186   : > { %858 = vst [vmem:[%s2044_s26 + $0xa0] sm:$0xff] %v813_v32  ;;  %v717_v54 = vpop.f32.mrf.mxu0  ;;  %v766_v58 = vpop.f32.mrf.mxu1 }
 0x187   : > { %859 = vst [vmem:[%s2044_s26 + $0xa8] sm:$0xff] %v717_v54 }
 0x188   : > { %860 = vst [vmem:[%s2044_s26 + $0xb0] sm:$0xff] %v766_v58 }
 0x18a   : > { %v786_v3 = vpop.f32.mrf.mxu3 }
 0x18b   : > { %884 = vst [vmem:[%s2044_s26 + $0x170] sm:$0xff] %v786_v3 }
 0x18d   : > { %v815_v13 = vpop.f32.mrf.mxu2 }
 0x18e   : > { %861 = vst [vmem:[%s2044_s26 + $0xb8] sm:$0xff] %v815_v13  ;;  %v720_v51 = vpop.f32.mrf.mxu0  ;;  %v769_v20 = vpop.f32.mrf.mxu1 }
 0x18f   : > { %862 = vst [vmem:[%s2044_s26 + $0xc0] sm:$0xff] %v720_v51 }
 0x190   : > { %863 = vst [vmem:[%s2044_s26 + $0xc8] sm:$0xff] %v769_v20 }
 0x192   : > { %v828_v12 = vpop.f32.mrf.mxu3 }
 0x193   : > { %876 = vst [vmem:[%s2044_s26 + $0x130] sm:$0xff] %v828_v12 }
 0x195   : > { %v818_v14 = vpop.f32.mrf.mxu2 }
 0x196   : > { %864 = vst [vmem:[%s2044_s26 + $0xd0] sm:$0xff] %v818_v14  ;;  %v722_v8 = vpop.f32.mrf.mxu0  ;;  %v771_v62 = vpop.f32.mrf.mxu1 }
 0x197   : > { %865 = vst [vmem:[%s2044_s26 + $0xd8] sm:$0xff] %v722_v8 }
 0x198   : > { %866 = vst [vmem:[%s2044_s26 + $0xe0] sm:$0xff] %v771_v62 }
 0x19a   : > { %v830_v1 = vpop.f32.mrf.mxu3 }
 0x19b   : > { %879 = vst [vmem:[%s2044_s26 + $0x148] sm:$0xff] %v830_v1 }
 0x19d   : > { %v820_v4 = vpop.f32.mrf.mxu2 }
 0x19e   : > { %867 = vst [vmem:[%s2044_s26 + $0xe8] sm:$0xff] %v820_v4  ;;  %v725_v10 = vpop.f32.mrf.mxu0  ;;  %v774_v45 = vpop.f32.mrf.mxu1 }
 0x19f   : > { %868 = vst [vmem:[%s2044_s26 + $0xf0] sm:$0xff] %v725_v10 }
 0x1a0   : > { %869 = vst [vmem:[%s2044_s26 + $0xf8] sm:$0xff] %v774_v45 }
 0x1a2   : > { %v833_v11 = vpop.f32.mrf.mxu3 }
 0x1a3   : > { %882 = vst [vmem:[%s2044_s26 + $0x160] sm:$0xff] %v833_v11 }
 0x1a5   : > { %v823_v24 = vpop.f32.mrf.mxu2 }
 0x1a6   : > { %870 = vst [vmem:[%s2044_s26 + $0x100] sm:$0xff] %v823_v24  ;;  %v727_v26 = vpop.f32.mrf.mxu0  ;;  %v776_v0 = vpop.f32.mrf.mxu1 }
 0x1a7   : > { %871 = vst [vmem:[%s2044_s26 + $0x108] sm:$0xff] %v727_v26 }
 0x1a8   : > { %872 = vst [vmem:[%s2044_s26 + $0x110] sm:$0xff] %v776_v0 }
 0x1aa   : > { %v835_v27 = vpop.f32.mrf.mxu3 }
 0x1ab   : > { %885 = vst [vmem:[%s2044_s26 + $0x178] sm:$0xff] %v835_v27 }
 0x1ad   : > { %v825_v29 = vpop.f32.mrf.mxu2 }
 0x1ae   : > { %873 = vst [vmem:[%s2044_s26 + $0x118] sm:$0xff] %v825_v29 }
 0x1af   : > { %1385 = shalt.err (!%p1382_p8)
}
 0x1b0   : > { %s1437_s28 = smov 384   ;;  %s1438_s30 = smov 24  }
 0x1b1   : > { %1169 = dma.vmem_to_hbm [thread:$0]  (%p1511_p11), %s901_s6, 6144, %s903_s9, %s887_s16, %s1437_s28, %s1437_s28, %s1438_s30  }
 0x1b2 PF: > { %s917_s1 = sand.u32 1, %s1416_s12   ;;  %p2162_p9 = scmp.ge.s32.totalorder %s1428_s15, 2 }
 0x1b3   : > { %s918_s5 = scalar_lea.sflag [#allocation4], %s917_s1 }
 0x1b4   : > { %p1183_p10 = pnand %p2162_p9, %p1515_p12 }
 0x1b6   : > { %p1184_p1 = pneg %p1183_p10 }
 0x1b8   : > { %1411 = dma.done.wait (%p1184_p1), %s918_s5, 6144  }
 0x1b9   : > { %1413 = vsyncadd (%p1184_p1), %s918_s5, 4294961152  ;;  %p17_p2 = scmp.ge.s32.totalorder %s1484_s18, 4   ;;  %s2163_s12 = smov %s1420_s13 }
 0x1ba   : > { %s2164_s13 = smov %s1424_s14  ;;  %s2165_s14 = smov %s1496_s21 }
 0x1bb   : > { %s2166_s15 = smov %s1484_s18  ;;  %19 = sbr.rel (!%p17_p2) target bundleno = 8 (0x8), region = 85 }
 0x1c0   :  { %924 = vsyncpa [#allocation3], 1 }
 0x1c1   :  { %926 = vsyncpa [#allocation3 + $0x1], 1 }
 0x1c2   :  { %927 = vsyncpa [#allocation6], 1 }
 0x1c3   :  { %928 = vsyncpa [#allocation4], 1 }
 0x1c4   :  { %930 = vsyncpa [#allocation4 + $0x1], 1 }

</bundles_post_ra>
